<compile_context>
chip_gen: v7x
topology: tpu7x:2x2x1
jax: 0.10.0
libtpu: 0.0.40
codegen_flags: <defaults>
</compile_context>

<pallas_src>
import functools

import jax
import jax.numpy as jnp
from jax import lax
from jax.experimental import pallas as pl
from jax.experimental.pallas import tpu as pltpu

_LANES = 128


def _round_down(x, m):
    return (x // m) * m


def _sse_kernel(pred_ref, gt_ref, out_ref):
    """out[r, :] = lane-wise partial sums of (pred[r] - gt[r])^2 over HW.

    pred_ref / gt_ref: (tile_n, HW) contiguous row slabs.
    out_ref:           (tile_n, 128) lane-dense partial (summed over lanes
                       in the epilogue outside the kernel).
    """
    hw = pred_ref.shape[-1]
    n_full = hw // _LANES
    rem = hw - n_full * _LANES

    acc = jnp.zeros(out_ref.shape, jnp.float32)

    # Pure VPU hot loop: fold HW in aligned 128-lane chunks.
    for c in range(n_full):
        lo = c * _LANES
        d = (pred_ref[:, lo:lo + _LANES].astype(jnp.float32)
             - gt_ref[:, lo:lo + _LANES].astype(jnp.float32))
        acc = acc + d * d

    if rem:
        # Tail (< 128 lanes): reduce it to a per-row scalar (XLU) and fold it
        # into lane 0 of the partial (avoids pad/concat inside the kernel).
        lo = n_full * _LANES
        d = (pred_ref[:, lo:].astype(jnp.float32)
             - gt_ref[:, lo:].astype(jnp.float32))
        rem_sum = jnp.sum(d * d, axis=-1, keepdims=True)          # (tile_n, 1)
        lane = lax.broadcasted_iota(jnp.int32, acc.shape, 1)      # (tile_n, 128)
        acc = acc + jnp.where(lane == 0, rem_sum, 0.0)

    out_ref[...] = acc


@functools.partial(jax.jit,
                   static_argnames=("use_target_weight", "topk", "max_tile_n"))
def joints_ohkm_mse_loss(output, target, target_weight, *,
                         use_target_weight=True, topk=8, max_tile_n=256):
    B, J, H, W = output.shape
    HW = H * W
    N = B * J
    assert topk <= J
    itemsize = jnp.dtype(output.dtype).itemsize

    # ---- per-chip VMEM sizing ------------------------------------------------
    try:
        vmem_cap = int(pltpu.get_tpu_info().vmem_capacity_bytes)
    except Exception:
        vmem_cap = 64 * 1024 * 1024          # v7x-safe fallback
    input_budget = int(vmem_cap * 0.40)      # double-buffered pred+gt slabs
    vmem_limit = int(vmem_cap * 0.75)

    # ---- choose tile_n (rows per grid step) ---------------------------------
    row_bytes = 2 * HW * itemsize                                  # pred + gt, one row
    tile_n_budget = max(8, input_budget // (2 * row_bytes))        # 2 pipeline buffers
    if N <= min(tile_n_budget, max_tile_n):
        tile_n = N                         # single block: dims equal full array
    else:
        tile_n = max(8, _round_down(min(tile_n_budget, max_tile_n), 8))
    grid_n = pl.cdiv(N, tile_n)
    n_rows_out = grid_n * tile_n           # output kept in-bounds; slice [:N] later

    # Make sure the limit covers the chosen blocks (tiny-VMEM / huge-HW edge).
    per_step_bytes = 2 * 2 * tile_n * HW * itemsize + 2 * tile_n * _LANES * 4
    vmem_limit = int(max(vmem_limit, per_step_bytes + (2 << 20)))

    pred = output.reshape(N, HW)           # free reshape, no HBM copy
    gt = target.reshape(N, HW)

    cost = pl.CostEstimate(
        flops=3 * N * HW,
        transcendentals=0,
        bytes_accessed=2 * N * HW * itemsize + n_rows_out * _LANES * 4,
    )

    in_spec = pl.BlockSpec((tile_n, HW), lambda i: (i, 0))

    partials = pl.pallas_call(
        _sse_kernel,
        out_shape=jax.ShapeDtypeStruct((n_rows_out, _LANES), jnp.float32),
        grid_spec=pltpu.PrefetchScalarGridSpec(
            num_scalar_prefetch=0,
            grid=(grid_n,),
            in_specs=[in_spec, in_spec],
            out_specs=pl.BlockSpec((tile_n, _LANES), lambda i: (i, 0)),
        ),
        compiler_params=pltpu.CompilerParams(
            dimension_semantics=("parallel",),
            vmem_limit_bytes=vmem_limit,
        ),
        cost_estimate=cost,
    )(pred, gt)

    # ---- tiny O(B*J) epilogue in plain JAX ----------------------------------
    sse = jnp.sum(partials[:N], axis=-1).reshape(B, J)             # (B, J)
    per_joint = 0.5 * sse / float(HW)
    if use_target_weight:
        # pred*w - gt*w == w*(pred-gt)  =>  squared error picks up a w^2 factor.
        w = target_weight.reshape(B, J).astype(jnp.float32)
        per_joint = per_joint * (w * w)
    topv, _ = lax.top_k(per_joint, topk)                           # (B, topk)
    return jnp.mean(jnp.sum(topv, axis=-1) / float(topk))


def _reference(output, target, target_weight, topk=8, use_target_weight=True):
    B, J = output.shape[:2]
    pred = output.reshape(B, J, -1).astype(jnp.float32)
    gt = target.reshape(B, J, -1).astype(jnp.float32)
    if use_target_weight:
        w = target_weight.reshape(B, J).astype(jnp.float32)
        pred = pred * w[..., None]
        gt = gt * w[..., None]
    per = 0.5 * jnp.mean((pred - gt) ** 2, axis=-1)                # (B, J)
    topv, _ = lax.top_k(per, topk)
    return jnp.mean(jnp.sum(topv, axis=-1) / float(topk))


if __name__ == "__main__":
    key = jax.random.PRNGKey(0)
    k1, k2, k3 = jax.random.split(key, 3)

    # COCO-style 17 joints, 24x24 heatmap: N = 34 (not a multiple of 8),
    # HW = 576 (4 full 128-lane chunks + a 64-lane tail).
    B, J, H, W = 2, 17, 24, 24
    output = jax.random.normal(k1, (B, J, H, W), dtype=jnp.float32)
    target = jax.random.normal(k2, (B, J, H, W), dtype=jnp.float32)
    target_weight = jax.random.uniform(k3, (B, J, 1), dtype=jnp.float32)

    ref = _reference(output, target, target_weight, topk=8)

    # Default path: single (N, HW) block.
    loss = joints_ohkm_mse_loss(output, target, target_weight,
                                use_target_weight=True, topk=8)
    loss = jax.block_until_ready(loss)
    assert jnp.allclose(loss, ref, rtol=1e-5, atol=1e-6), (loss, ref)

    # Force multi-block tiling along N with a ragged final block (N=34, tile_n=16).
    loss_tiled = joints_ohkm_mse_loss(output, target, target_weight,
                                      use_target_weight=True, topk=8,
                                      max_tile_n=16)
    loss_tiled = jax.block_until_ready(loss_tiled)
    assert jnp.allclose(loss_tiled, ref, rtol=1e-5, atol=1e-6), (loss_tiled, ref)

    # use_target_weight=False path.
    ref_nw = _reference(output, target, target_weight, topk=8,
                        use_target_weight=False)
    loss_nw = joints_ohkm_mse_loss(output, target, target_weight,
                                   use_target_weight=False, topk=8)
    loss_nw = jax.block_until_ready(loss_nw)
    assert jnp.allclose(loss_nw, ref_nw, rtol=1e-5, atol=1e-6), (loss_nw, ref_nw)

    # Evenly-divided multi-block case, rem == 0 (HW = 256), bf16 heatmaps.
    B2, J2, H2, W2 = 2, 16, 16, 16
    kk1, kk2, kk3 = jax.random.split(jax.random.PRNGKey(1), 3)
    out_bf = jax.random.normal(kk1, (B2, J2, H2, W2)).astype(jnp.bfloat16)
    tgt_bf = jax.random.normal(kk2, (B2, J2, H2, W2)).astype(jnp.bfloat16)
    w2 = jax.random.uniform(kk3, (B2, J2, 1), dtype=jnp.float32)
    ref_bf = _reference(out_bf, tgt_bf, w2, topk=8)
    loss_bf = joints_ohkm_mse_loss(out_bf, tgt_bf, w2,
                                   use_target_weight=True, topk=8,
                                   max_tile_n=8)
    loss_bf = jax.block_until_ready(loss_bf)
    assert jnp.allclose(loss_bf, ref_bf, rtol=1e-4, atol=1e-5), (loss_bf, ref_bf)

    print("KERNEL_OK")
</pallas_src>

<mosaic_0001>
module attributes {stable_mosaic.version = 11 : i64} {
  func.func @_sse_kernel(%arg0: i32, %arg1: memref<34x576xf32, #tpu.memory_space<vmem>>, %arg2: memref<34x576xf32, #tpu.memory_space<vmem>>, %arg3: memref<34x128xf32, #tpu.memory_space<vmem>>) attributes {dimension_semantics = [#tpu.dimension_semantics<parallel>], iteration_bounds = array<i64: 1>, scalar_prefetch = 0 : i64, scratch_operands = 0 : i64, tpu.core_type = #tpu.core_type<tc>, window_params = [{transform_indices = @transform_0, window_bounds = array<i64: 34, 576>}, {transform_indices = @transform_1, window_bounds = array<i64: 34, 576>}, {transform_indices = @transform_2, window_bounds = array<i64: 34, 128>}]} {
    %cst = arith.constant 0.000000e+00 : f32
    %0 = vector.broadcast %cst : f32 to vector<34x128xf32>
    %c0 = arith.constant 0 : index
    %c0_0 = arith.constant 0 : index
    %1 = vector.load %arg1[%c0, %c0_0] : memref<34x576xf32, #tpu.memory_space<vmem>>, vector<34x128xf32>
    %c0_1 = arith.constant 0 : index
    %c0_2 = arith.constant 0 : index
    %2 = vector.load %arg2[%c0_1, %c0_2] : memref<34x576xf32, #tpu.memory_space<vmem>>, vector<34x128xf32>
    %3 = arith.subf %1, %2 : vector<34x128xf32>
    %4 = arith.mulf %3, %3 : vector<34x128xf32>
    %5 = arith.addf %0, %4 : vector<34x128xf32>
    %c0_3 = arith.constant 0 : index
    %c128 = arith.constant 128 : index
    %6 = vector.load %arg1[%c0_3, %c128] : memref<34x576xf32, #tpu.memory_space<vmem>>, vector<34x128xf32>
    %c0_4 = arith.constant 0 : index
    %c128_5 = arith.constant 128 : index
    %7 = vector.load %arg2[%c0_4, %c128_5] : memref<34x576xf32, #tpu.memory_space<vmem>>, vector<34x128xf32>
    %8 = arith.subf %6, %7 : vector<34x128xf32>
    %9 = arith.mulf %8, %8 : vector<34x128xf32>
    %10 = arith.addf %5, %9 : vector<34x128xf32>
    %c0_6 = arith.constant 0 : index
    %c256 = arith.constant 256 : index
    %11 = vector.load %arg1[%c0_6, %c256] : memref<34x576xf32, #tpu.memory_space<vmem>>, vector<34x128xf32>
    %c0_7 = arith.constant 0 : index
    %c256_8 = arith.constant 256 : index
    %12 = vector.load %arg2[%c0_7, %c256_8] : memref<34x576xf32, #tpu.memory_space<vmem>>, vector<34x128xf32>
    %13 = arith.subf %11, %12 : vector<34x128xf32>
    %14 = arith.mulf %13, %13 : vector<34x128xf32>
    %15 = arith.addf %10, %14 : vector<34x128xf32>
    %c0_9 = arith.constant 0 : index
    %c384 = arith.constant 384 : index
    %16 = vector.load %arg1[%c0_9, %c384] : memref<34x576xf32, #tpu.memory_space<vmem>>, vector<34x128xf32>
    %c0_10 = arith.constant 0 : index
    %c384_11 = arith.constant 384 : index
    %17 = vector.load %arg2[%c0_10, %c384_11] : memref<34x576xf32, #tpu.memory_space<vmem>>, vector<34x128xf32>
    %18 = arith.subf %16, %17 : vector<34x128xf32>
    %19 = arith.mulf %18, %18 : vector<34x128xf32>
    %20 = arith.addf %15, %19 : vector<34x128xf32>
    %c0_12 = arith.constant 0 : index
    %c512 = arith.constant 512 : index
    %21 = vector.load %arg1[%c0_12, %c512] : memref<34x576xf32, #tpu.memory_space<vmem>>, vector<34x64xf32>
    %c0_13 = arith.constant 0 : index
    %c512_14 = arith.constant 512 : index
    %22 = vector.load %arg2[%c0_13, %c512_14] : memref<34x576xf32, #tpu.memory_space<vmem>>, vector<34x64xf32>
    %23 = arith.subf %21, %22 : vector<34x64xf32>
    %24 = arith.mulf %23, %23 : vector<34x64xf32>
    %cst_15 = arith.constant dense<0.000000e+00> : vector<34xf32>
    %25 = vector.multi_reduction <add>, %24, %cst_15 [1] : vector<34x64xf32> to vector<34xf32>
    %26 = vector.shape_cast %25 : vector<34xf32> to vector<34x1xf32>
    %27 = tpu.iota {dimensions = array<i32: 1>} : vector<34x128xi32>
    %c0_i32 = arith.constant 0 : i32
    %28 = vector.broadcast %c0_i32 : i32 to vector<34x128xi32>
    %29 = arith.cmpi eq, %27, %28 : vector<34x128xi32>
    %cst_16 = arith.constant 0.000000e+00 : f32
    %30 = vector.shape_cast %26 : vector<34x1xf32> to vector<34x1xf32>
    %31 = vector.broadcast %30 : vector<34x1xf32> to vector<34x128xf32>
    %32 = vector.broadcast %cst_16 : f32 to vector<34x128xf32>
    %33 = arith.select %29, %31, %32 : vector<34x128xi1>, vector<34x128xf32>
    %34 = arith.addf %20, %33 : vector<34x128xf32>
    %c0_17 = arith.constant 0 : index
    %c0_18 = arith.constant 0 : index
    %35 = vector.load %arg3[%c0_17, %c0_18] : memref<34x128xf32, #tpu.memory_space<vmem>>, vector<34x128xf32>
    tpu.vector_store %arg3[%c0_17, %c0_18], %34 {strides = array<i32>} : memref<34x128xf32, #tpu.memory_space<vmem>>, vector<34x128xf32>,
    return
  }
  func.func @transform_0(%arg0: i32) -> (i32, i32) {
    %c0_i32 = arith.constant 0 : i32
    %c0_i32_0 = arith.constant 0 : i32
    return %arg0, %c0_i32 : i32, i32
  }
  func.func @transform_1(%arg0: i32) -> (i32, i32) {
    %c0_i32 = arith.constant 0 : i32
    %c0_i32_0 = arith.constant 0 : i32
    return %arg0, %c0_i32 : i32, i32
  }
  func.func @transform_2(%arg0: i32) -> (i32, i32) {
    %c0_i32 = arith.constant 0 : i32
    %c0_i32_0 = arith.constant 0 : i32
    return %arg0, %c0_i32 : i32, i32
  }
}

</mosaic_0001>

<bundles_post_ra>
// kernel: mul.0
= control target key start
LH: loop header
LB: loop body
LE: loop exit
PB: predicated region body
PF: predicated region fallthrough
CT: control target
= control target key end

     0   :  { %s56_s0 = inlined_call_operand.vmem [shape: f32[2,17,1], index: 0, kind: input, shape index: {}, may-alias: {0,1}]   ;;  %s57_s1 = inlined_call_operand.vmem [shape: f32[2,17,1], index: 1, kind: input, shape index: {}, may-alias: {0,1}]   ;;  %s58_s2 = inlined_call_operand.vmem [shape: f32[2,17,1], index: 2, kind: output, shape index: {}]  }
   0x1   :  { %v3_v0 = vld [vmem:[%s56_s0] sm:$0x1]  ;;  %v20_v2 = vld [vmem:[%s56_s0 + $0x1] sm:$0x1] }
   0x2   :  { %v4_v1 = vld [vmem:[%s57_s1] sm:$0x1]  ;;  %v21_v4 = vld [vmem:[%s57_s1 + $0x1] sm:$0x1] }
   0x3   :  { %v7_v3 = vmul.f32 %v4_v1, %v3_v0  ;;  %v16_v5 = vmul.f32 %v21_v4, %v20_v2 }
   0x5   :  { %9 = vst [vmem:[%s58_s2] sm:$0x1] %v7_v3  ;;  %22 = vst [vmem:[%s58_s2 + $0x1] sm:$0x1] %v16_v5 }

// kernel: mul.7
= control target key start
LH: loop header
LB: loop body
LE: loop exit
PB: predicated region body
PF: predicated region fallthrough
CT: control target
= control target key end

     0   :  { %s34_s0 = inlined_call_operand.vmem [shape: f32[2,17], index: 0, kind: input, shape index: {}]   ;;  %s35_s1 = inlined_call_operand.vmem [shape: f32[2,17], index: 1, kind: input, shape index: {}]   ;;  %s36_s2 = inlined_call_operand.vmem [shape: f32[2,17], index: 2, kind: output, shape index: {}]  }
   0x1   :  { %v3_v0 = vld [vmem:[%s34_s0] sm:$0x3] }
   0x2   :  { %v4_v1 = vld [vmem:[%s35_s1] sm:$0x3] }
   0x3   :  { %v7_v2 = vmul.f32 %v4_v1, %v3_v0 }
   0x5   :  { %9 = vst [vmem:[%s36_s2] sm:$0x3] %v7_v2 }

// kernel: joints_ohkm_mse_loss.1
= control target key start
LH: loop header
LB: loop body
LE: loop exit
PB: predicated region body
PF: predicated region fallthrough
CT: control target
= control target key end

     0   :  { %vm131_vm0 = vcmask 523264   ;;  %vm144_vm1 = vcmask 517120   ;;  %s362_s0 = inlined_call_operand.vmem [shape: f32[34,576], index: 0, kind: input, shape index: {}]   ;;  %s363_s1 = inlined_call_operand.vmem [shape: f32[34,576], index: 1, kind: input, shape index: {}]   ;;  %s364_s2 = inlined_call_operand.vmem [shape: f32[34,128], index: 2, kind: output, shape index: {}]  }
   0x1   :  { %v111_v0 = vld [vmem:[%s362_s0 + $0x20] sm:$0xff]  ;;  %v113_v2 = vld [vmem:[%s362_s0 + $0x70] sm:$0xff]  ;;  %v112_v5 = vld [vmem:[%s362_s0 + $0x48] sm:$0xff] }
   0x2   :  { %v116_v1 = vld [vmem:[%s363_s1 + $0x20] sm:$0xff]  ;;  %v118_v4 = vld [vmem:[%s363_s1 + $0x70] sm:$0xff]  ;;  %v117_v6 = vld [vmem:[%s363_s1 + $0x48] sm:$0xff] }
   0x3   :  { %v121_v3 = vsub.f32 %v111_v0, %v116_v1  ;;  %v123_v7 = vsub.f32 %v113_v2, %v118_v4  ;;  %v122_v8 = vsub.f32 %v112_v5, %v117_v6  ;;  %v114_v9 = vld [vmem:[%s362_s0 + $0x98] sm:$0xff]  ;;  %v115_v11 = vld [vmem:[%s362_s0 + $0xc0] sm:$0x3]  ;;  %v41_v25 = vld [vmem:[%s363_s1 + $0x8] sm:$0xff] }
   0x4   :  { %v119_v10 = vld [vmem:[%s363_s1 + $0x98] sm:$0xff]  ;;  %v120_v14 = vld [vmem:[%s363_s1 + $0xc0] sm:$0x3]  ;;  %v66_v26 = vld [vmem:[%s363_s1 + $0x10] sm:$0xff] }
   0x5   :  { %v126_v12 = vmul.f32 %v121_v3, %v121_v3  ;;  %v124_v13 = vsub.f32 %v114_v9, %v119_v10  ;;  %v128_v15 = vmul.f32 %v123_v7, %v123_v7  ;;  %v127_v16 = vmul.f32 %v122_v8, %v122_v8  ;;  %v16_v24 = vld [vmem:[%s363_s1] sm:$0xff]  ;;  %v36_v28 = vld [vmem:[%s362_s0 + $0x8] sm:$0xff]  ;;  %v91_v32 = vld [vmem:[%s363_s1 + $0x18] sm:$0xff] }
   0x6   :  { %v125_v17 = vsub.f32 %v115_v11, %v120_v14  ;;  %v11_v27 = vld [vmem:[%s362_s0] sm:$0xff]  ;;  %v46_v31 = vsub.f32 %v36_v28, %v41_v25  ;;  %v61_v33 = vld [vmem:[%s362_s0 + $0x10] sm:$0xff]  ;;  %v86_v37 = vld [vmem:[%s362_s0 + $0x18] sm:$0xff] }
   0x7   :  { %v132_v18 = vsel %vm131_vm0, %v126_v12, 0.0  ;;  %v129_v19 = vmul.f32 %v124_v13, %v124_v13  ;;  %v138_v20 = vsel %vm131_vm0, %v128_v15, 0.0  ;;  %v135_v21 = vsel %vm131_vm0, %v127_v16, 0.0  ;;  %v18_v38 = vld [vmem:[%s363_s1 + $0x50] sm:$0xff]  ;;  %v43_v39 = vld [vmem:[%s363_s1 + $0x58] sm:$0xff]  ;;  %v17_v45 = vld [vmem:[%s363_s1 + $0x28] sm:$0xff] }
   0x8   :  { %133 = vadd.xlane.f32.xlu0 %v132_v18  ;;  %139 = vadd.xlane.f32.xlu1 %v138_v20  ;;  %v130_v22 = vmul.f32 %v125_v17, %v125_v17  ;;  %v21_v30 = vsub.f32 %v11_v27, %v16_v24  ;;  %v51_v35 = vmul.f32 %v46_v31, %v46_v31  ;;  %v13_v43 = vld [vmem:[%s362_s0 + $0x50] sm:$0xff]  ;;  %v38_v44 = vld [vmem:[%s362_s0 + $0x58] sm:$0xff]  ;;  %v68_v46 = vld [vmem:[%s363_s1 + $0x60] sm:$0xff] }
   0x9   :  { %v141_v23 = vsel %vm131_vm0, %v129_v19, 0.0  ;;  %v71_v36 = vsub.f32 %v61_v33, %v66_v26  ;;  %v96_v42 = vsub.f32 %v86_v37, %v91_v32  ;;  %v23_v47 = vsub.f32 %v13_v43, %v18_v38  ;;  %v63_v49 = vld [vmem:[%s362_s0 + $0x60] sm:$0xff]  ;;  %v42_v50 = vld [vmem:[%s363_s1 + $0x30] sm:$0xff]  ;;  %v67_v54 = vld [vmem:[%s363_s1 + $0x38] sm:$0xff] }
   0xa   :  { %v145_v29 = vsel %vm144_vm1, %v130_v22, 0.0  ;;  %v26_v34 = vmul.f32 %v21_v30, %v21_v30  ;;  %v48_v48 = vsub.f32 %v38_v44, %v43_v39  ;;  %v73_v53 = vsub.f32 %v63_v49, %v68_v46  ;;  %v12_v55 = vld [vmem:[%s362_s0 + $0x28] sm:$0xff]  ;;  %v37_v56 = vld [vmem:[%s362_s0 + $0x30] sm:$0xff]  ;;  %v92_v61 = vld [vmem:[%s363_s1 + $0x40] sm:$0xff] }
   0xb   :  { %v76_v41 = vmul.f32 %v71_v36, %v71_v36  ;;  %v101_v52 = vmul.f32 %v96_v42, %v96_v42  ;;  %v93_v57 = vld [vmem:[%s363_s1 + $0x68] sm:$0xff]  ;;  %v28_v58 = vmul.f32 %v23_v47, %v23_v47  ;;  %v22_v62 = vsub.f32 %v12_v55, %v17_v45  ;;  %v62_v3 = vld [vmem:[%s362_s0 + $0x38] sm:$0xff]  ;;  %v87_v4 = vld [vmem:[%s362_s0 + $0x40] sm:$0xff] }
   0xc   :  { %136 = vadd.xlane.f32.xlu0 %v135_v21  ;;  %142 = vadd.xlane.f32.xlu1 %v141_v23  ;;  %v56_v40 = vadd.f32 %v51_v35, %v26_v34  ;;  %v53_v59 = vmul.f32 %v48_v48, %v48_v48  ;;  %v88_v60 = vld [vmem:[%s362_s0 + $0x68] sm:$0xff]  ;;  %v47_v63 = vsub.f32 %v37_v56, %v42_v50  ;;  %v19_v5 = vld [vmem:[%s363_s1 + $0x78] sm:$0xff]  ;;  %v44_v10 = vld [vmem:[%s363_s1 + $0x80] sm:$0xff]  ;;  %v148_v56 = vlaneseq }
   0xd   :  { %v78_v1 = vmul.f32 %v73_v53, %v73_v53  ;;  %v98_v2 = vsub.f32 %v88_v60, %v93_v57  ;;  %v27_v7 = vmul.f32 %v22_v62, %v22_v62  ;;  %v72_v9 = vsub.f32 %v62_v3, %v67_v54  ;;  %v69_v11 = vld [vmem:[%s363_s1 + $0x88] sm:$0xff]  ;;  %v14_v12 = vld [vmem:[%s362_s0 + $0x78] sm:$0xff]  ;;  %v39_v16 = vld [vmem:[%s362_s0 + $0x80] sm:$0xff] }
   0xe   :  { %v81_v51 = vadd.f32 %v76_v41, %v56_v40  ;;  %v58_v6 = vadd.f32 %v53_v59, %v28_v58  ;;  %v52_v8 = vmul.f32 %v47_v63, %v47_v63  ;;  %v97_v14 = vsub.f32 %v87_v4, %v92_v61  ;;  %v64_v17 = vld [vmem:[%s362_s0 + $0x88] sm:$0xff]  ;;  %v20_v18 = vld [vmem:[%s363_s1 + $0xa0] sm:$0x3]  ;;  %v94_v22 = vld [vmem:[%s363_s1 + $0x90] sm:$0xff] }
   0xf   :  { %v103_v13 = vmul.f32 %v98_v2, %v98_v2  ;;  %v24_v15 = vsub.f32 %v14_v12, %v19_v5  ;;  %v77_v21 = vmul.f32 %v72_v9, %v72_v9  ;;  %v49_v23 = vsub.f32 %v39_v16, %v44_v10  ;;  %v89_v24 = vld [vmem:[%s362_s0 + $0x90] sm:$0xff]  ;;  %v45_v25 = vld [vmem:[%s363_s1 + $0xa8] sm:$0x3]  ;;  %v95_v31 = vld [vmem:[%s363_s1 + $0xb8] sm:$0x3] }
  0x10   :  { %146 = vadd.xlane.f32.xlu0 %v145_v29  ;;  %v285_v0 = vadd.f32 %v101_v52, %v81_v51  ;;  %v83_v19 = vadd.f32 %v78_v1, %v58_v6  ;;  %v57_v20 = vadd.f32 %v52_v8, %v27_v7  ;;  %v102_v26 = vmul.f32 %v97_v14, %v97_v14  ;;  %v70_v30 = vld [vmem:[%s363_s1 + $0xb0] sm:$0x3]  ;;  %v15_v32 = vld [vmem:[%s362_s0 + $0xa0] sm:$0x3]  ;;  %v40_v37 = vld [vmem:[%s362_s0 + $0xa8] sm:$0x3] }
  0x11   :  { %v29_v27 = vmul.f32 %v24_v15, %v24_v15  ;;  %v74_v28 = vsub.f32 %v64_v17, %v69_v11  ;;  %v99_v29 = vsub.f32 %v89_v24, %v94_v22  ;;  %v54_v35 = vmul.f32 %v49_v23, %v49_v23  ;;  %v65_v38 = vld [vmem:[%s362_s0 + $0xb0] sm:$0x3]  ;;  %v90_v39 = vld [vmem:[%s362_s0 + $0xb8] sm:$0x3] }
  0x12   :  { %v108_v33 = vadd.f32 %v103_v13, %v83_v19  ;;  %v82_v34 = vadd.f32 %v77_v21, %v57_v20  ;;  %v25_v36 = vsub.f32 %v15_v32, %v20_v18  ;;  %v50_v42 = vsub.f32 %v40_v37, %v45_v25 }
  0x13   :  { %v79_v40 = vmul.f32 %v74_v28, %v74_v28  ;;  %v104_v41 = vmul.f32 %v99_v29, %v99_v29  ;;  %v75_v43 = vsub.f32 %v65_v38, %v70_v30  ;;  %v59_v45 = vadd.f32 %v54_v35, %v29_v27 }
  0x14   :  { %v107_v44 = vadd.f32 %v102_v26, %v82_v34  ;;  %v30_v46 = vmul.f32 %v25_v36, %v25_v36  ;;  %v100_v47 = vsub.f32 %v90_v39, %v95_v31  ;;  %v55_v48 = vmul.f32 %v50_v42, %v50_v42 }
  0x15   :  { %v80_v49 = vmul.f32 %v75_v43, %v75_v43  ;;  %v84_v50 = vadd.f32 %v79_v40, %v59_v45  ;;  %v149_v57 = vand.u32 127, %v148_v56 }
  0x16   :  { %v60_v51 = vadd.f32 %v55_v48, %v30_v46  ;;  %v105_v52 = vmul.f32 %v100_v47, %v100_v47 }
  0x17   :  { %v109_v53 = vadd.f32 %v104_v41, %v84_v50  ;;  %vm150_vm2 = vcmp.eq.s32.totalorder %v149_v57, 0 }
  0x18   :  { %v85_v54 = vadd.f32 %v80_v49, %v60_v51 }
  0x1a   :  { %v110_v55 = vadd.f32 %v105_v52, %v85_v54 }
  0x95   :  { %v134_v58 = vpop.xlane.xlu0 %133  ;;  %v140_v60 = vpop.xlane.xlu1 %139 }
  0x96   :  { %v151_v59 = vsel %vm150_vm2, %v134_v58, 0.0  ;;  %v153_v62 = vsel %vm150_vm2, %v140_v60, 0.0 }
  0x97   :  { %v156_v61 = vadd.f32 %v151_v59, %v285_v0  ;;  %v158_v63 = vadd.f32 %v153_v62, %v108_v33 }
  0x99   :  { %161 = vst [vmem:[%s364_s2] sm:$0xff] %v156_v61  ;;  %v137_v1 = vpop.xlane.xlu0 %136  ;;  %163 = vst [vmem:[%s364_s2 + $0x10] sm:$0xff] %v158_v63  ;;  %v143_v3 = vpop.xlane.xlu1 %142 }
  0x9a   :  { %v152_v2 = vsel %vm150_vm2, %v137_v1, 0.0  ;;  %v154_v5 = vsel %vm150_vm2, %v143_v3, 0.0 }
  0x9b   :  { %v157_v4 = vadd.f32 %v152_v2, %v107_v44  ;;  %v159_v6 = vadd.f32 %v154_v5, %v109_v53 }
  0x9d   :  { %162 = vst [vmem:[%s364_s2 + $0x8] sm:$0xff] %v157_v4  ;;  %v147_v0 = vpop.xlane.xlu0 %146  ;;  %164 = vst [vmem:[%s364_s2 + $0x18] sm:$0xff] %v159_v6 }
  0x9e   :  { %v155_v7 = vsel %vm150_vm2, %v147_v0, 0.0 }
  0x9f   :  { %v160_v8 = vadd.f32 %v155_v7, %v110_v55 }
  0xa1   :  { %165 = vst [vmem:[%s364_s2 + $0x20] sm:$0x3] %v160_v8 }

</bundles_post_ra>
